<compile_context>
chip_gen: v7x
topology: tpu7x:2x2x1
jax: 0.10.0
libtpu: 0.0.40
codegen_flags: <defaults>
</compile_context>

<pallas_src>
import functools

import jax
import jax.numpy as jnp
from jax.experimental import pallas as pl
from jax.experimental.pallas import tpu as pltpu

LANE = 128     # lane-dense padded feature width for the hidden layers
HIDDEN = 32    # DQN hidden size (from the PyTorch module)


def _round_up(x, m):
    return ((x + m - 1) // m) * m


def dqn_kernel(x_ref, w_ref, b_ref, o_ref, xpad_ref, *, state_size, action_size):
    # x_ref   : (TM, state_size) f32 activations at natural width (no HBM padding)
    # w_ref   : (3, 128, 128)    bf16 packed [W1; W2; W3], zero-padded
    # b_ref   : (8, 128)         f32 packed biases in rows 0..2, zero elsewhere
    # o_ref   : (TM, action_size) f32 Q-values (narrow writeback)
    # xpad_ref: (TM, 128)        f32 scratch used to lane-pad x inside VMEM
    xpad_ref[...] = jnp.zeros_like(xpad_ref)
    xpad_ref[:, :state_size] = x_ref[...]
    x = xpad_ref[...].astype(jnp.bfloat16)            # (TM,128) bf16 MXU operand

    b = b_ref[...]                                    # (8,128) f32
    h1 = jnp.dot(x, w_ref[0], preferred_element_type=jnp.float32) + b[0:1]
    h1 = jnp.maximum(h1, 0.0)
    h2 = jnp.dot(h1.astype(jnp.bfloat16), w_ref[1],
                 preferred_element_type=jnp.float32) + b[1:2]
    h2 = jnp.maximum(h2, 0.0)
    q = jnp.dot(h2.astype(jnp.bfloat16), w_ref[2],
                preferred_element_type=jnp.float32) + b[2:3]
    # Narrow Q writeback: only the real action columns leave the kernel.
    o_ref[...] = q[:, :action_size]


def dqn_forward(x, packed_params, *, action_size, block_batch=1024):
    """x: (batch, state_size) f32. Returns (batch, action_size) f32 Q-values."""
    w_packed, b_packed = packed_params
    batch, state_size = x.shape

    # Tile/grid selection: no pad overshoot, and >= 2 grid steps for batch >= 16
    # so v7x's two TensorCores both get work (harmless on v5e/v6e).
    min_tiles = 2 if batch >= 16 else 1
    num_tiles = max(pl.cdiv(batch, block_batch), min_tiles)
    tm = _round_up(pl.cdiv(batch, num_tiles), 8)
    b_pad = num_tiles * tm

    # Row-only padding of the natural-width input (state_size columns -> cheap).
    x = x.astype(jnp.float32)
    x_in = x if b_pad == batch else jnp.pad(x, ((0, b_pad - batch), (0, 0)))

    flops = 2 * batch * (state_size * HIDDEN + HIDDEN * HIDDEN + HIDDEN * action_size)
    bytes_accessed = (4 * x_in.size + 2 * w_packed.size + 4 * b_packed.size
                      + 4 * b_pad * action_size)

    kernel = functools.partial(
        dqn_kernel, state_size=state_size, action_size=action_size)

    out = pl.pallas_call(
        kernel,
        out_shape=jax.ShapeDtypeStruct((b_pad, action_size), jnp.float32),
        grid_spec=pltpu.PrefetchScalarGridSpec(
            num_scalar_prefetch=0,
            grid=(num_tiles,),
            in_specs=[
                # Activations at natural width, tiled over the batch grid.
                pl.BlockSpec((tm, state_size), lambda i: (i, 0)),
                # Packed bf16 weights: constant block -> DMA'd once, VMEM-resident.
                pl.BlockSpec((3, LANE, LANE), lambda i: (0, 0, 0)),
                # Packed f32 biases: constant block -> VMEM-resident.
                pl.BlockSpec((8, LANE), lambda i: (0, 0)),
            ],
            # Narrow Q output; last dim equals the full array dim (legal block).
            out_specs=pl.BlockSpec((tm, action_size), lambda i: (i, 0)),
            scratch_shapes=[pltpu.VMEM((tm, LANE), jnp.float32)],
        ),
        compiler_params=pltpu.CompilerParams(
            # Batch axis is embarrassingly parallel -> shard across v7x's 2 TCs.
            dimension_semantics=("parallel",),
            # Per-step working set is well under 1 MiB; 32 MiB fits every
            # generation (v7x physical VMEM is 64 MiB).
            vmem_limit_bytes=32 * 1024 * 1024,
        ),
        cost_estimate=pl.CostEstimate(
            flops=flops, transcendentals=0, bytes_accessed=bytes_accessed),
    )(x_in, w_packed, b_packed)

    # Drop padded rows before anything downstream (argmax / TD math) sees them.
    return out[:batch]


def init_params(key, state_size, action_size):
    # Deterministic init mimicking nn.Linear's U(-1/sqrt(fan_in), 1/sqrt(fan_in)).
    def linear(key, fan_in, fan_out):
        kw, kb = jax.random.split(key)
        bound = 1.0 / jnp.sqrt(jnp.float32(fan_in))
        w = jax.random.uniform(kw, (fan_in, fan_out), jnp.float32, -bound, bound)
        b = jax.random.uniform(kb, (fan_out,), jnp.float32, -bound, bound)
        return w, b

    k1, k2, k3 = jax.random.split(key, 3)
    w1, b1 = linear(k1, state_size, HIDDEN)
    w2, b2 = linear(k2, HIDDEN, HIDDEN)
    w3, b3 = linear(k3, HIDDEN, action_size)
    return (w1, b1, w2, b2, w3, b3)


def pack_params(params, state_size, action_size):
    """Pack the 6 tiny parameter tensors: bf16 weights (MXU operands), f32 biases."""
    w1, b1, w2, b2, w3, b3 = params
    w_packed = jnp.zeros((3, LANE, LANE), jnp.float32)
    w_packed = w_packed.at[0, :state_size, :HIDDEN].set(w1)
    w_packed = w_packed.at[1, :HIDDEN, :HIDDEN].set(w2)
    w_packed = w_packed.at[2, :HIDDEN, :action_size].set(w3)
    w_packed = w_packed.astype(jnp.bfloat16)          # MXU operand dtype
    b_packed = jnp.zeros((8, LANE), jnp.float32)      # bias-add stays f32
    b_packed = b_packed.at[0, :HIDDEN].set(b1)
    b_packed = b_packed.at[1, :HIDDEN].set(b2)
    b_packed = b_packed.at[2, :action_size].set(b3)
    return w_packed, b_packed


def dqn_reference(x, params):
    w1, b1, w2, b2, w3, b3 = params
    h1 = jnp.maximum(x @ w1 + b1, 0.0)
    h2 = jnp.maximum(h1 @ w2 + b2, 0.0)
    return h2 @ w3 + b3


if __name__ == "__main__":
    # MountainCar: state_size=2, action_size=3; small batch of states.
    batch, state_size, action_size = 8, 2, 3

    key = jax.random.PRNGKey(0)
    kx, kp = jax.random.split(key)
    x = jax.random.normal(kx, (batch, state_size), jnp.float32)
    params = init_params(kp, state_size, action_size)
    packed = pack_params(params, state_size, action_size)

    out = jax.block_until_ready(dqn_forward(x, packed, action_size=action_size))
    ref = dqn_reference(x, params)
    assert out.shape == (batch, action_size)
    # bf16 MXU operands -> relaxed tolerance vs the pure-f32 reference.
    assert jnp.allclose(out, ref, atol=5e-2, rtol=2e-2), float(jnp.max(jnp.abs(out - ref)))

    # Larger, multi-step grid (exercises pipelining, 2-TC split, odd batch padding).
    xl = jax.random.normal(kx, (1024 + 40, state_size), jnp.float32)
    out_l = jax.block_until_ready(dqn_forward(xl, packed, action_size=action_size))
    ref_l = dqn_reference(xl, params)
    assert out_l.shape == ref_l.shape
    assert jnp.allclose(out_l, ref_l, atol=5e-2, rtol=2e-2), float(jnp.max(jnp.abs(out_l - ref_l)))

    print("KERNEL_OK")
</pallas_src>

<mosaic_0001>
module attributes {stable_mosaic.version = 11 : i64} {
  func.func @dqn_kernel(%arg0: i32, %arg1: memref<8x2xf32, #tpu.memory_space<vmem>>, %arg2: memref<3x128x128xbf16, #tpu.memory_space<vmem>>, %arg3: memref<8x128xf32, #tpu.memory_space<vmem>>, %arg4: memref<8x3xf32, #tpu.memory_space<vmem>>, %arg5: memref<8x128xf32, #tpu.memory_space<vmem>>) attributes {dimension_semantics = [#tpu.dimension_semantics<parallel>], iteration_bounds = array<i64: 1>, scalar_prefetch = 0 : i64, scratch_operands = 1 : i64, tpu.core_type = #tpu.core_type<tc>, window_params = [{transform_indices = @transform_0, window_bounds = array<i64: 8, 2>}, {pipeline_mode = #tpu.pipeline_mode<synchronous>, transform_indices = @transform_1, window_bounds = array<i64: 3, 128, 128>}, {pipeline_mode = #tpu.pipeline_mode<synchronous>, transform_indices = @transform_2, window_bounds = array<i64: 8, 128>}, {transform_indices = @transform_3, window_bounds = array<i64: 8, 3>}]} {
    %cst = arith.constant 0.000000e+00 : f32
    %0 = vector.broadcast %cst : f32 to vector<8x128xf32>
    %c0 = arith.constant 0 : index
    %c0_0 = arith.constant 0 : index
    %1 = vector.load %arg5[%c0, %c0_0] : memref<8x128xf32, #tpu.memory_space<vmem>>, vector<8x128xf32>
    tpu.vector_store %arg5[%c0, %c0_0], %0 {strides = array<i32>} : memref<8x128xf32, #tpu.memory_space<vmem>>, vector<8x128xf32>,
    %c0_1 = arith.constant 0 : index
    %c0_2 = arith.constant 0 : index
    %2 = vector.load %arg1[%c0_1, %c0_2] : memref<8x2xf32, #tpu.memory_space<vmem>>, vector<8x2xf32>
    %c0_3 = arith.constant 0 : index
    %c0_4 = arith.constant 0 : index
    %3 = vector.load %arg5[%c0_3, %c0_4] : memref<8x128xf32, #tpu.memory_space<vmem>>, vector<8x2xf32>
    tpu.vector_store %arg5[%c0_3, %c0_4], %2 {strides = array<i32>} : memref<8x128xf32, #tpu.memory_space<vmem>>, vector<8x2xf32>,
    %c0_5 = arith.constant 0 : index
    %c0_6 = arith.constant 0 : index
    %4 = vector.load %arg5[%c0_5, %c0_6] : memref<8x128xf32, #tpu.memory_space<vmem>>, vector<8x128xf32>
    %5 = arith.truncf %4 : vector<8x128xf32> to vector<8x128xbf16>
    %c0_7 = arith.constant 0 : index
    %c0_8 = arith.constant 0 : index
    %6 = vector.load %arg3[%c0_7, %c0_8] : memref<8x128xf32, #tpu.memory_space<vmem>>, vector<8x128xf32>
    %c0_9 = arith.constant 0 : index
    %c0_10 = arith.constant 0 : index
    %c0_11 = arith.constant 0 : index
    %7 = vector.load %arg2[%c0_9, %c0_10, %c0_11] : memref<3x128x128xbf16, #tpu.memory_space<vmem>>, vector<1x128x128xbf16>
    %8 = vector.shape_cast %7 : vector<1x128x128xbf16> to vector<128x128xbf16>
    %cst_12 = arith.constant dense<0.000000e+00> : vector<8x128xf32>
    %9 = tpu.matmul %5, %8, %cst_12 {dimension_numbers = #tpu.dot_dimension_numbers<[1], [0], [0], [1], [0, 0, 1, 1], [], []>} : vector<8x128xbf16>, vector<128x128xbf16>, vector<8x128xf32> -> vector<8x128xf32>
    %10 = vector.extract_strided_slice %6 {offsets = [0, 0], sizes = [1, 128], strides = [1, 1]} : vector<8x128xf32> to vector<1x128xf32>
    %11 = vector.broadcast %10 : vector<1x128xf32> to vector<8x128xf32>
    %12 = arith.addf %9, %11 : vector<8x128xf32>
    %cst_13 = arith.constant 0.000000e+00 : f32
    %13 = vector.broadcast %cst_13 : f32 to vector<8x128xf32>
    %14 = arith.maximumf %12, %13 : vector<8x128xf32>
    %15 = arith.truncf %14 : vector<8x128xf32> to vector<8x128xbf16>
    %c1 = arith.constant 1 : index
    %c0_14 = arith.constant 0 : index
    %c0_15 = arith.constant 0 : index
    %16 = vector.load %arg2[%c1, %c0_14, %c0_15] : memref<3x128x128xbf16, #tpu.memory_space<vmem>>, vector<1x128x128xbf16>
    %17 = vector.shape_cast %16 : vector<1x128x128xbf16> to vector<128x128xbf16>
    %cst_16 = arith.constant dense<0.000000e+00> : vector<8x128xf32>
    %18 = tpu.matmul %15, %17, %cst_16 {dimension_numbers = #tpu.dot_dimension_numbers<[1], [0], [0], [1], [0, 0, 1, 1], [], []>} : vector<8x128xbf16>, vector<128x128xbf16>, vector<8x128xf32> -> vector<8x128xf32>
    %19 = vector.extract_strided_slice %6 {offsets = [1, 0], sizes = [1, 128], strides = [1, 1]} : vector<8x128xf32> to vector<1x128xf32>
    %20 = vector.broadcast %19 : vector<1x128xf32> to vector<8x128xf32>
    %21 = arith.addf %18, %20 : vector<8x128xf32>
    %cst_17 = arith.constant 0.000000e+00 : f32
    %22 = vector.broadcast %cst_17 : f32 to vector<8x128xf32>
    %23 = arith.maximumf %21, %22 : vector<8x128xf32>
    %24 = arith.truncf %23 : vector<8x128xf32> to vector<8x128xbf16>
    %c2 = arith.constant 2 : index
    %c0_18 = arith.constant 0 : index
    %c0_19 = arith.constant 0 : index
    %25 = vector.load %arg2[%c2, %c0_18, %c0_19] : memref<3x128x128xbf16, #tpu.memory_space<vmem>>, vector<1x128x128xbf16>
    %26 = vector.shape_cast %25 : vector<1x128x128xbf16> to vector<128x128xbf16>
    %cst_20 = arith.constant dense<0.000000e+00> : vector<8x128xf32>
    %27 = tpu.matmul %24, %26, %cst_20 {dimension_numbers = #tpu.dot_dimension_numbers<[1], [0], [0], [1], [0, 0, 1, 1], [], []>} : vector<8x128xbf16>, vector<128x128xbf16>, vector<8x128xf32> -> vector<8x128xf32>
    %28 = vector.extract_strided_slice %6 {offsets = [2, 0], sizes = [1, 128], strides = [1, 1]} : vector<8x128xf32> to vector<1x128xf32>
    %29 = vector.broadcast %28 : vector<1x128xf32> to vector<8x128xf32>
    %30 = arith.addf %27, %29 : vector<8x128xf32>
    %31 = vector.extract_strided_slice %30 {offsets = [0, 0], sizes = [8, 3], strides = [1, 1]} : vector<8x128xf32> to vector<8x3xf32>
    %c0_21 = arith.constant 0 : index
    %c0_22 = arith.constant 0 : index
    %32 = vector.load %arg4[%c0_21, %c0_22] : memref<8x3xf32, #tpu.memory_space<vmem>>, vector<8x3xf32>
    tpu.vector_store %arg4[%c0_21, %c0_22], %31 {strides = array<i32>} : memref<8x3xf32, #tpu.memory_space<vmem>>, vector<8x3xf32>,
    return
  }
  func.func @transform_0(%arg0: i32) -> (i32, i32) {
    %c0_i32 = arith.constant 0 : i32
    %c0_i32_0 = arith.constant 0 : i32
    return %arg0, %c0_i32 : i32, i32
  }
  func.func @transform_1(%arg0: i32) -> (i32, i32, i32) {
    %c0_i32 = arith.constant 0 : i32
    %c0_i32_0 = arith.constant 0 : i32
    %c0_i32_1 = arith.constant 0 : i32
    %c0_i32_2 = arith.constant 0 : i32
    return %c0_i32, %c0_i32_0, %c0_i32_1 : i32, i32, i32
  }
  func.func @transform_2(%arg0: i32) -> (i32, i32) {
    %c0_i32 = arith.constant 0 : i32
    %c0_i32_0 = arith.constant 0 : i32
    %c0_i32_1 = arith.constant 0 : i32
    return %c0_i32, %c0_i32_0 : i32, i32
  }
  func.func @transform_3(%arg0: i32) -> (i32, i32) {
    %c0_i32 = arith.constant 0 : i32
    %c0_i32_0 = arith.constant 0 : i32
    return %arg0, %c0_i32 : i32, i32
  }
}

</mosaic_0001>

<bundles_post_ra>
// kernel: tpu_custom_call.1
= control target key start
LH: loop header
LB: loop body
LE: loop exit
PB: predicated region body
PF: predicated region fallthrough
CT: control target
= control target key end

     0   :  { %8 = vsyncpa [#allocation4], 0  ;;  %s537_s12 = smov [#allocation3]   ;;  %s614_s0 = inlined_call_operand.vmem [shape: f32[8,2], index: 0, kind: input, shape index: {}]   ;;  %s615_s1 = inlined_call_operand.hbm [shape: bf16[3,128,128], index: 1, kind: input, shape index: {}]   ;;  %s616_s2 = inlined_call_operand.vmem [shape: f32[8,128], index: 2, kind: input, shape index: {}]   ;;  %s617_s3 = inlined_call_operand.vmem [shape: f32[8,3], index: 3, kind: output, shape index: {}]  }
   0x1   :  { %s16_s13 = sshll.u32 %s537_s12, 4  ;;  %s513_s16 = scalar_lea.hbm %s615_s1, 3072  ;;  %s17_s13 = int_to_ptr.vmem [resolvable:$true] %s16_s13 }
   0x2   :  { %p514_p0 = scmp.ne.s32.totalorder %s615_s1, %s513_s16  ;;  %p517_p1 = scmp.lt.u32.totalorder %s513_s16, %s615_s1 }
   0x4   :  { %p519_p2 = pnand %p517_p1, %p514_p0 }
   0x6   :  { %522 = shalt.err (!%p519_p2)
}
   0x7   :  { %s523_s21 = scalar_lea.vmem %s17_s13, 3072  ;;  %p528_p4 = scmp.lt.s32.totalorder %s17_s13, %s17_s13 }
   0x8   :  { %p524_p3 = scmp.ne.s32.totalorder %s17_s13, %s523_s21  ;;  %p529_p5 = scmp.lt.s32.totalorder %s523_s21, %s523_s21 }
   0xa   :  { %p530_p6 = por %p529_p5, %p528_p4 }
   0xc   :  { %p531_p7 = pnand %p530_p6, %p524_p3 }
   0xe   :  { %534 = shalt.err (!%p531_p7)
}
   0xf   :  { %s538_s22 = smov 64   ;;  %s539_s23 = smov 4  }
  0x10   :  { %22 = dma.hbm_to_vmem [thread:$0]  %s615_s1, 3072, %s17_s13, [#allocation4], %s538_s22, %s538_s22, %s539_s23  }
  0x11   :  { %535 = dma.done.wait [#allocation4], 3072  }
  0x12   :  { %536 = vsyncadd [#allocation4], 4294964224  ;;  %v540_v0 = vmov 0.0   ;;  %vm541_vm0 = vmmov 0   ;;  %v489_v1 = vld [vmem:[#allocation3] sm:$0xff]   ;;  %v490_v2 = vld [vmem:[#allocation3 + $0x8] sm:$0xff]   ;;  %v52_v26 = vlaneseq }
  0x13   :  { %424 = vmatprep.subr.bf16.mxu0 %v540_v0  ;;  %29 = vst [vmem:[#allocation2] sm:$0xff] %v540_v0  ;;  %440 = vmatprep.mubr.msk.bf16.mxu0 %vm541_vm0, %v540_v0  ;;  %v491_v3 = vld [vmem:[#allocation3 + $0x10] sm:$0xff]   ;;  %vm31_vm1 = vcmask 15360   ;;  %v497_v5 = vld [vmem:[#allocation3 + $0x40] sm:$0xff]   ;;  %v492_v6 = vld [vmem:[#allocation3 + $0x18] sm:$0xff]   ;;  %vm366_vm2 = vcmask 23552  }
  0x14   :  { %444 = vmatprep.subr.bf16.mxu1 %v540_v0  ;;  %460 = vmatprep.mubr.msk.bf16.mxu1 %vm541_vm0, %v540_v0  ;;  %v30_v4 = vld [vmem:[%s614_s0] sm:$0xff]  ;;  %v498_v7 = vld [vmem:[#allocation3 + $0x48] sm:$0xff]   ;;  %v493_v8 = vld [vmem:[#allocation3 + $0x20] sm:$0xff]   ;;  %v53_v27 = vshrl.u32 %v52_v26, 7 }
  0x15   :  { %425 = vmatpush3.bf16.msra.mxu0 %v489_v1  ;;  %32 = vst.msk [vmem:[#allocation2] sm:$0xff] %vm31_vm1, %v30_v4  ;;  %445 = vmatpush3.bf16.msra.mxu1 %v497_v5  ;;  %v499_v9 = vld [vmem:[#allocation3 + $0x50] sm:$0xff]   ;;  %v494_v10 = vld [vmem:[#allocation3 + $0x28] sm:$0xff]   ;;  %v500_v11 = vld [vmem:[#allocation3 + $0x58] sm:$0xff]  }
  0x16   :  { %426 = vmatprep.subr.bf16.mxu0 %v540_v0  ;;  %446 = vmatprep.subr.bf16.mxu1 %v540_v0  ;;  %v495_v12 = vld [vmem:[#allocation3 + $0x30] sm:$0xff]   ;;  %v501_v13 = vld [vmem:[#allocation3 + $0x60] sm:$0xff]   ;;  %v496_v14 = vld [vmem:[#allocation3 + $0x38] sm:$0xff]   ;;  %v54_v28 = vsub.s32 0, %v53_v27  ;;  %v165_v40 = vsub.s32 1, %v53_v27  ;;  %v276_v49 = vsub.s32 2, %v53_v27 }
  0x17   :  { %v502_v16 = vld [vmem:[#allocation3 + $0x68] sm:$0xff]   ;;  %v503_v18 = vld [vmem:[#allocation3 + $0x70] sm:$0xff]   ;;  %v504_v19 = vld [vmem:[#allocation3 + $0x78] sm:$0xff]  }
  0x18   :  { %v505_v20 = vld [vmem:[#allocation3 + $0x80] sm:$0xff]   ;;  %v506_v21 = vld [vmem:[#allocation3 + $0x88] sm:$0xff]   ;;  %v507_v22 = vld [vmem:[#allocation3 + $0x90] sm:$0xff]  }
  0x19   :  { %427 = vmatpush3.bf16.msra.mxu0 %v490_v2  ;;  %447 = vmatpush3.bf16.msra.mxu1 %v498_v7  ;;  %v508_v23 = vld [vmem:[#allocation3 + $0x98] sm:$0xff]   ;;  %v509_v24 = vld [vmem:[#allocation3 + $0xa0] sm:$0xff]   ;;  %v510_v25 = vld [vmem:[#allocation3 + $0xa8] sm:$0xff]  }
  0x1a   :  { %428 = vmatprep.subr.bf16.mxu0 %v540_v0  ;;  %448 = vmatprep.subr.bf16.mxu1 %v540_v0  ;;  %v35_v29 = vld [vmem:[%s616_s2] sm:$0xff]  ;;  %v512_v39 = vld [vmem:[#allocation3 + $0xb8] sm:$0xff]  }
  0x1b   :  { %v55_v30 = vrot.slane %v35_v29, %v54_v28  ;;  %v511_v38 = vld [vmem:[#allocation3 + $0xb0] sm:$0xff]   ;;  %v166_v41 = vrot.slane %v35_v29, %v165_v40  ;;  %v277_v50 = vrot.slane %v35_v29, %v276_v49 }
  0x1c   :  { %v33_v15 = vld [vmem:[#allocation2] sm:$0xff] }
  0x1d   :  { %429 = vmatpush3.bf16.msra.mxu0 %v491_v3  ;;  %449 = vmatpush3.bf16.msra.mxu1 %v499_v9  ;;  %v34_v17 = vpack.c.bf16 %v33_v15, %v33_v15 }
  0x1e   :  { %430 = vmatprep.subr.bf16.mxu0 %v540_v0  ;;  %450 = vmatprep.subr.bf16.mxu1 %v540_v0 }
  0x21   :  { %431 = vmatpush3.bf16.msra.mxu0 %v492_v6  ;;  %451 = vmatpush3.bf16.msra.mxu1 %v500_v11 }
  0x22   :  { %432 = vmatprep.subr.bf16.mxu0 %v540_v0  ;;  %452 = vmatprep.subr.bf16.mxu1 %v540_v0 }
  0x25   :  { %433 = vmatpush3.bf16.msra.mxu0 %v493_v8  ;;  %453 = vmatpush3.bf16.msra.mxu1 %v501_v13 }
  0x26   :  { %434 = vmatprep.subr.bf16.mxu0 %v540_v0  ;;  %454 = vmatprep.subr.bf16.mxu1 %v540_v0 }
  0x29   :  { %435 = vmatpush3.bf16.msra.mxu0 %v494_v10  ;;  %455 = vmatpush3.bf16.msra.mxu1 %v502_v16 }
  0x2a   :  { %436 = vmatprep.subr.bf16.mxu0 %v540_v0  ;;  %456 = vmatprep.subr.bf16.mxu1 %v540_v0 }
  0x2d   :  { %437 = vmatpush3.bf16.msra.mxu0 %v495_v12  ;;  %457 = vmatpush3.bf16.msra.mxu1 %v503_v18 }
  0x2e   :  { %438 = vmatprep.subr.bf16.mxu0 %v540_v0  ;;  %458 = vmatprep.subr.bf16.mxu1 %v540_v0 }
  0x31   :  { %439 = vmatpush3.bf16.msra.mxu0 %v496_v14  ;;  %459 = vmatpush3.bf16.msra.mxu1 %v504_v19 }
  0x32   :  { %464 = vmatprep.subr.bf16.mxu0 %v540_v0 }
  0x34   :  { %441 = vmatmul.mubr.bf16.vlgmr.msra.gmra.mrb[0].mxu0 %v34_v17 }
  0x35   :  { %480 = vmatprep.mubr.msk.bf16.mxu0 %vm541_vm0, %v540_v0  ;;  %465 = vmatpush3.bf16.msra.mxu0 %v505_v20 }
  0x36   :  { %466 = vmatprep.subr.bf16.mxu0 %v540_v0 }
  0x39   :  { %467 = vmatpush3.bf16.msra.mxu0 %v506_v21 }
  0x3a   :  { %468 = vmatprep.subr.bf16.mxu0 %v540_v0 }
  0x3d   :  { %469 = vmatpush3.bf16.msra.mxu0 %v507_v22 }
  0x3e   :  { %470 = vmatprep.subr.bf16.mxu0 %v540_v0 }
  0x41   :  { %471 = vmatpush3.bf16.msra.mxu0 %v508_v23 }
  0x42   :  { %472 = vmatprep.subr.bf16.mxu0 %v540_v0 }
  0x45   :  { %473 = vmatpush3.bf16.msra.mxu0 %v509_v24 }
  0x46   :  { %474 = vmatprep.subr.bf16.mxu0 %v540_v0 }
  0x49   :  { %475 = vmatpush3.bf16.msra.mxu0 %v510_v25 }
  0x4a   :  { %476 = vmatprep.subr.bf16.mxu0 %v540_v0 }
  0x4d   :  { %477 = vmatpush3.bf16.msra.mxu0 %v511_v38 }
  0x4e   :  { %478 = vmatprep.subr.bf16.mxu0 %v540_v0 }
  0x51   :  { %479 = vmatpush3.bf16.msra.mxu0 %v512_v39 }
 0x107   :  { %v138_v31 = vpop.f32.mrb[0].mxu0 }
 0x108   :  { %v139_v32 = vadd.f32 %v138_v31, %v55_v30  ;;  %v442_v33 = vpop.f32.mrb[1].mxu0 }
 0x109   :  { %v141_v34 = vpop.f32.mrb[2].mxu0 }
 0x10a   :  { %v144_v35 = vmax.f32 %v139_v32, 0.0  ;;  %v443_v36 = vpop.f32.mrb[3].mxu0 }
 0x10c   :  { %v145_v37 = vpack.c.bf16 %v144_v35, %v144_v35 }
 0x10e   :  { %461 = vmatmul.mubr.bf16.vlgmr.msra.gmra.mrb[0].mxu1 %v145_v37 }
 0x1e1   :  { %v249_v42 = vpop.f32.mrb[0].mxu1 }
 0x1e2   :  { %v250_v43 = vadd.f32 %v249_v42, %v166_v41  ;;  %v462_v44 = vpop.f32.mrb[1].mxu1 }
 0x1e3   :  { %v252_v45 = vpop.f32.mrb[2].mxu1 }
 0x1e4   :  { %v255_v46 = vmax.f32 %v250_v43, 0.0  ;;  %v463_v47 = vpop.f32.mrb[3].mxu1 }
 0x1e6   :  { %v256_v48 = vpack.c.bf16 %v255_v46, %v255_v46 }
 0x1e8   :  { %481 = vmatmul.mubr.bf16.vlgmr.msra.gmra.mrb[4].mxu0 %v256_v48 }
 0x2bb   :  { %v360_v51 = vpop.f32.mrb[4].mxu0 }
 0x2bc   :  { %v361_v52 = vadd.f32 %v360_v51, %v277_v50  ;;  %v482_v53 = vpop.f32.mrb[5].mxu0 }
 0x2bd   :  { %v363_v54 = vpop.f32.mrb[6].mxu0 }
 0x2be   :  { %367 = vst.msk [vmem:[%s617_s3] sm:$0xff] %vm366_vm2, %v361_v52  ;;  %v483_v55 = vpop.f32.mrb[7].mxu0 }
 0x2bf   :  { %372 = vsyncpa [#allocation4], 1 }

</bundles_post_ra>
